<compile_context>
chip_gen: v7x
topology: tpu7x:2x2x1
jax: 0.10.0
libtpu: 0.0.40
codegen_flags: <defaults>
</compile_context>

<pallas_src>
import jax
import jax.numpy as jnp
from jax.experimental import pallas as pl
from jax.experimental.pallas import tpu as pltpu


def conv3x3_relu_kernel(xT_ref, wT_ref, b_ref, oT_ref):
    # xT_ref: (K, TM)  im2col columns, M on lanes (dense)
    # wT_ref: (Cout, K) weights, VMEM-resident
    # b_ref : (Cout, 1) bias (f32)
    # oT_ref: (Cout, TM) lane-dense output
    acc = jnp.dot(wT_ref[...], xT_ref[...], preferred_element_type=jnp.float32)
    acc = acc + b_ref[...]                       # broadcast along lanes
    oT_ref[...] = jnp.maximum(acc, 0.0).astype(oT_ref.dtype)


def _round_up(x, m):
    return ((x + m - 1) // m) * m


def conv_layer_forward(x_nchw, weight, bias, *, stride=2, padding=1,
                       tm=1024, compute_dtype=jnp.bfloat16):
    """Equivalent of ConvLayer.forward: relu(conv2d_3x3(x)), NCHW in/out."""
    N, Cin, H, W = x_nchw.shape
    Cout = weight.shape[0]
    KH = KW = 3
    Ho = (H + 2 * padding - KH) // stride + 1
    Wo = (W + 2 * padding - KW) // stride + 1
    M = N * Ho * Wo
    K = KH * KW * Cin

    # ---- glue: pad NCHW, build transposed im2col x^T of shape (K, M) ----
    # K axis ordered (kh, kw, cin); M axis ordered (n, ho, wo).  No layout
    # transposes of the feature map are needed for this orientation.
    xp = jnp.pad(x_nchw, ((0, 0), (0, 0), (padding, padding), (padding, padding)))
    taps = []
    for kh in range(KH):
        for kw in range(KW):
            taps.append(xp[:, :, kh:kh + (Ho - 1) * stride + 1:stride,
                               kw:kw + (Wo - 1) * stride + 1:stride])  # (N,Cin,Ho,Wo)
    xT = jnp.stack(taps, axis=0)                       # (9, N, Cin, Ho, Wo)
    xT = jnp.transpose(xT, (0, 2, 1, 3, 4)).reshape(K, M).astype(compute_dtype)
    wT = jnp.transpose(weight, (0, 2, 3, 1)).reshape(Cout, K).astype(compute_dtype)
    b_col = bias.reshape(Cout, 1).astype(jnp.float32)

    # ---- tile M (lane dim): multiple of 128; >=2 grid steps when possible ----
    LANE = 128
    if M <= LANE:
        TM = M                                    # single block, equal-to-full-dim
    else:
        TM = min(max(tm - tm % LANE, LANE), _round_up(M, LANE))
        if pl.cdiv(M, TM) < 2:                    # make v7x megacore usable
            TM = max(LANE, _round_up(pl.cdiv(M, 2), LANE))
    grid = (pl.cdiv(M, TM),)

    in_itemsize = jnp.dtype(compute_dtype).itemsize
    # VMEM plan: 2x double-buffered input tiles + 2x output tiles + weights/bias.
    tile_bytes = (2 * K * TM * in_itemsize
                  + 2 * Cout * TM * 4
                  + Cout * K * in_itemsize
                  + Cout * 4)
    vmem_limit = int(min(64 * 1024 * 1024, max(16 * 1024 * 1024, 2 * tile_bytes)))

    cost = pl.CostEstimate(
        flops=2 * M * K * Cout,
        transcendentals=0,
        bytes_accessed=(K * M + Cout * K) * in_itemsize + Cout * M * 4 + Cout * 4,
    )

    outT = pl.pallas_call(
        conv3x3_relu_kernel,
        out_shape=jax.ShapeDtypeStruct((Cout, M), jnp.float32),
        grid_spec=pltpu.PrefetchScalarGridSpec(
            num_scalar_prefetch=0,
            grid=grid,
            in_specs=[
                pl.BlockSpec((K, TM), lambda i: (0, i)),      # im2col cols, tiled over M
                pl.BlockSpec((Cout, K), lambda i: (0, 0)),    # weights, resident
                pl.BlockSpec((Cout, 1), lambda i: (0, 0)),    # bias, resident
            ],
            out_specs=pl.BlockSpec((Cout, TM), lambda i: (0, i)),
        ),
        compiler_params=pltpu.CompilerParams(
            dimension_semantics=("parallel",),    # megacore sharding on v7x
            vmem_limit_bytes=vmem_limit,
        ),
        cost_estimate=cost,
    )(xT, wT, b_col)

    # (Cout, M) -> (Cout, N, Ho, Wo) -> NCHW (cheap leading-axes swap).
    out = outT.reshape(Cout, N, Ho, Wo)
    return jnp.transpose(out, (1, 0, 2, 3))


if __name__ == "__main__":
    # Small shapes consistent with the module: batch=2, Cin=4, Cout=8, 16x16.
    N, Cin, Cout, H, W = 2, 4, 8, 16, 16
    stride, padding = 2, 1

    key = jax.random.PRNGKey(0)
    kx, kw, kb = jax.random.split(key, 3)

    x = jax.random.normal(kx, (N, Cin, H, W), dtype=jnp.float32)

    # Deterministic parameter init (PyTorch Conv2d-style uniform bound).
    fan_in = Cin * 3 * 3
    bound = 1.0 / (fan_in ** 0.5)
    weight = jax.random.uniform(kw, (Cout, Cin, 3, 3), jnp.float32,
                                minval=-bound, maxval=bound)
    bias = jax.random.uniform(kb, (Cout,), jnp.float32,
                              minval=-bound, maxval=bound)

    out = conv_layer_forward(x, weight, bias, stride=stride, padding=padding)
    out = jax.block_until_ready(out)

    # Reference: XLA conv on the same bf16-rounded operands the kernel uses,
    # f32 accumulation -> tight tolerance remains valid with bf16 MXU operands.
    xr = x.astype(jnp.bfloat16).astype(jnp.float32)
    wr = weight.astype(jnp.bfloat16).astype(jnp.float32)
    ref = jax.lax.conv_general_dilated(
        xr, wr, window_strides=(stride, stride),
        padding=((padding, padding), (padding, padding)),
        dimension_numbers=("NCHW", "OIHW", "NCHW"),
        precision=jax.lax.Precision.HIGHEST)
    ref = jnp.maximum(ref + bias[None, :, None, None], 0.0)

    Ho = (H + 2 * padding - 3) // stride + 1
    Wo = (W + 2 * padding - 3) // stride + 1
    assert out.shape == (N, Cout, Ho, Wo)
    assert jnp.allclose(out, ref, atol=1e-3, rtol=1e-3), \
        float(jnp.max(jnp.abs(out - ref)))

    print("KERNEL_OK")
</pallas_src>

<mosaic_0001>
module attributes {stable_mosaic.version = 11 : i64} {
  func.func @conv3x3_relu_kernel(%arg0: i32, %arg1: memref<36x128xbf16, #tpu.memory_space<vmem>>, %arg2: memref<8x36xbf16, #tpu.memory_space<vmem>>, %arg3: memref<8x1xf32, #tpu.memory_space<vmem>>, %arg4: memref<8x128xf32, #tpu.memory_space<vmem>>) attributes {dimension_semantics = [#tpu.dimension_semantics<parallel>], iteration_bounds = array<i64: 1>, scalar_prefetch = 0 : i64, scratch_operands = 0 : i64, tpu.core_type = #tpu.core_type<tc>, window_params = [{transform_indices = @transform_0, window_bounds = array<i64: 36, 128>}, {pipeline_mode = #tpu.pipeline_mode<synchronous>, transform_indices = @transform_1, window_bounds = array<i64: 8, 36>}, {pipeline_mode = #tpu.pipeline_mode<synchronous>, transform_indices = @transform_2, window_bounds = array<i64: 8, 1>}, {transform_indices = @transform_3, window_bounds = array<i64: 8, 128>}]} {
    %c0 = arith.constant 0 : index
    %c0_0 = arith.constant 0 : index
    %0 = vector.load %arg2[%c0, %c0_0] : memref<8x36xbf16, #tpu.memory_space<vmem>>, vector<8x36xbf16>
    %c0_1 = arith.constant 0 : index
    %c0_2 = arith.constant 0 : index
    %1 = vector.load %arg1[%c0_1, %c0_2] : memref<36x128xbf16, #tpu.memory_space<vmem>>, vector<36x128xbf16>
    %cst = arith.constant dense<0.000000e+00> : vector<8x128xf32>
    %2 = tpu.matmul %0, %1, %cst {dimension_numbers = #tpu.dot_dimension_numbers<[1], [0], [0], [1], [0, 0, 1, 1], [], []>} : vector<8x36xbf16>, vector<36x128xbf16>, vector<8x128xf32> -> vector<8x128xf32>
    %c0_3 = arith.constant 0 : index
    %c0_4 = arith.constant 0 : index
    %3 = vector.load %arg3[%c0_3, %c0_4] : memref<8x1xf32, #tpu.memory_space<vmem>>, vector<8x1xf32>
    %4 = vector.broadcast %3 : vector<8x1xf32> to vector<8x128xf32>
    %5 = arith.addf %2, %4 : vector<8x128xf32>
    %cst_5 = arith.constant 0.000000e+00 : f32
    %6 = vector.broadcast %cst_5 : f32 to vector<8x128xf32>
    %7 = arith.maximumf %5, %6 : vector<8x128xf32>
    %c0_6 = arith.constant 0 : index
    %c0_7 = arith.constant 0 : index
    %8 = vector.load %arg4[%c0_6, %c0_7] : memref<8x128xf32, #tpu.memory_space<vmem>>, vector<8x128xf32>
    tpu.vector_store %arg4[%c0_6, %c0_7], %7 {strides = array<i32>} : memref<8x128xf32, #tpu.memory_space<vmem>>, vector<8x128xf32>,
    return
  }
  func.func @transform_0(%arg0: i32) -> (i32, i32) {
    %c0_i32 = arith.constant 0 : i32
    %c0_i32_0 = arith.constant 0 : i32
    return %c0_i32, %arg0 : i32, i32
  }
  func.func @transform_1(%arg0: i32) -> (i32, i32) {
    %c0_i32 = arith.constant 0 : i32
    %c0_i32_0 = arith.constant 0 : i32
    %c0_i32_1 = arith.constant 0 : i32
    return %c0_i32, %c0_i32_0 : i32, i32
  }
  func.func @transform_2(%arg0: i32) -> (i32, i32) {
    %c0_i32 = arith.constant 0 : i32
    %c0_i32_0 = arith.constant 0 : i32
    %c0_i32_1 = arith.constant 0 : i32
    return %c0_i32, %c0_i32_0 : i32, i32
  }
  func.func @transform_3(%arg0: i32) -> (i32, i32) {
    %c0_i32 = arith.constant 0 : i32
    %c0_i32_0 = arith.constant 0 : i32
    return %c0_i32, %arg0 : i32, i32
  }
}

</mosaic_0001>

<bundles_post_ra>
// kernel: tpu_custom_call.1
= control target key start
LH: loop header
LB: loop body
LE: loop exit
PB: predicated region body
PF: predicated region fallthrough
CT: control target
= control target key end

     0   :  { %8 = vsyncpa [#allocation3], 0  ;;  %s256_s0 = inlined_call_operand.hbm [shape: bf16[36,128], index: 0, kind: input, shape index: {}]   ;;  %s257_s1 = inlined_call_operand.vmem [shape: bf16[8,36], index: 1, kind: input, shape index: {}]   ;;  %s258_s2 = inlined_call_operand.vmem [shape: f32[8,1], index: 2, kind: input, shape index: {}]   ;;  %s259_s3 = inlined_call_operand.hbm [shape: f32[8,128], index: 3, kind: output, shape index: {}]  }
   0x1   :  { %9 = vsyncpa [#allocation4], 0  ;;  %s199_s12 = smov [#allocation2]   ;;  %s151_s16 = scalar_lea.hbm %s256_s0, 320 }
   0x2   :  { %s15_s13 = sshll.u32 %s199_s12, 4  ;;  %p152_p0 = scmp.ne.s32.totalorder %s256_s0, %s151_s16  ;;  %s16_s13 = int_to_ptr.vmem [resolvable:$true] %s15_s13 }
   0x3   :  { %p155_p1 = scmp.lt.u32.totalorder %s151_s16, %s256_s0 }
   0x5   :  { %p157_p2 = pnand %p155_p1, %p152_p0 }
   0x7   :  { %160 = shalt.err (!%p157_p2)
}
   0x8   :  { %s161_s21 = scalar_lea.vmem %s16_s13, 320  ;;  %p166_p4 = scmp.lt.s32.totalorder %s16_s13, %s16_s13 }
   0x9   :  { %p162_p3 = scmp.ne.s32.totalorder %s16_s13, %s161_s21  ;;  %p167_p5 = scmp.lt.s32.totalorder %s161_s21, %s161_s21 }
   0xb   :  { %p168_p6 = por %p167_p5, %p166_p4 }
   0xd   :  { %p169_p7 = pnand %p168_p6, %p162_p3 }
   0xf   :  { %172 = shalt.err (!%p169_p7)
}
  0x10   :  { %s200_s22 = smov 64   ;;  %s201_s23 = smov 4  }
  0x11   :  { %21 = dma.hbm_to_vmem [thread:$0]  %s256_s0, 320, %s16_s13, [#allocation3], %s200_s22, %s200_s22, %s201_s23  }
  0x12   :  { %195 = dma.done.wait [#allocation3], 320  }
  0x13   :  { %196 = vsyncadd [#allocation3], 4294966976  ;;  %v202_v0 = vmov 0.0   ;;  %vm203_vm0 = vmmov 0   ;;  %v204_v1 = vmov 0   ;;  %v148_v2 = vld [vmem:[#allocation2] sm:$0xff]  }
  0x14   :  { %130 = vmatprep.subr.bf16.mxu0 %v202_v0  ;;  %136 = vmatprep.mubr.msk.bf16.mxu0 %vm203_vm0, %v202_v0  ;;  %v149_v3 = vld [vmem:[#allocation2 + $0x8] sm:$0xff]   ;;  %v36_v4 = vld [vmem:[%s258_s2] sm:$0xff]  ;;  %v150_v5 = vld [vmem:[#allocation2 + $0x10] ss:$0 sps:$4 sm:$0x33]   ;;  %vm61_vm1 = vcmask 1041408  }
  0x15   :  { %147 = vset.pattern.permute.xlu0 %v204_v1  ;;  %131 = vmatpush3.bf16.msra.mxu0 %v148_v2  ;;  %v63_v6 = vsel %vm61_vm1, %v150_v5, 0  ;;  %v30_v7 = vld [vmem:[%s257_s1] sm:$0xf]  ;;  %vm57_vm2 = vcmask 293888   ;;  %s205_s29 = smov [#allocation5]  }
  0x16   :  { %132 = vmatprep.subr.bf16.mxu0 %v202_v0  ;;  %39 = vperm.xlu0 %147, %v36_v4   ;;  %s113_s30 = sshll.u32 %s205_s29, 4  ;;  %s114_s30 = int_to_ptr.vmem [resolvable:$true] %s113_s30 }
  0x17   :  { %s173_s2 = scalar_lea.vmem %s114_s30, 128  ;;  %p178_p9 = scmp.lt.s32.totalorder %s114_s30, %s114_s30 }
  0x18   :  { %p174_p8 = scmp.ne.s32.totalorder %s114_s30, %s173_s2  ;;  %p179_p10 = scmp.lt.s32.totalorder %s173_s2, %s173_s2 }
  0x19   :  { %133 = vmatpush3.bf16.msra.mxu0 %v149_v3 }
  0x1a   :  { %134 = vmatprep.subr.bf16.mxu0 %v202_v0  ;;  %p180_p11 = por %p179_p10, %p178_p9 }
  0x1c   :  { %p181_p12 = pnand %p180_p11, %p174_p8 }
  0x1d   :  { %135 = vmatpush3.bf16.msra.mxu0 %v63_v6 }
  0x20   :  { %137 = vmatmul.mubr.msk.bf16.vlgmr.msra.gmra.mrb[0].mxu0 %vm57_vm2, %v30_v7 }
  0x95   :  { %v40_v8 = vpop.permute.xlu0 %39 }
  0xf3   :  { %v99_v9 = vpop.f32.mrb[0].mxu0 }
  0xf4   :  { %v100_v10 = vadd.f32 %v99_v9, %v40_v8  ;;  %v138_v11 = vpop.f32.mrb[1].mxu0 }
  0xf5   :  { %v102_v12 = vpop.f32.mrb[2].mxu0 }
  0xf6   :  { %v105_v13 = vmax.f32 %v100_v10, 0.0  ;;  %v139_v14 = vpop.f32.mrb[3].mxu0 }
  0xf8   :  { %106 = vst [vmem:[#allocation5] sm:$0xff] %v105_v13 }
  0xf9   :  { %184 = shalt.err (!%p181_p12)
}
  0xfa   :  { %s185_s5 = scalar_lea.hbm %s259_s3, 128 }
  0xfb   :  { %p186_p13 = scmp.ne.s32.totalorder %s259_s3, %s185_s5  ;;  %p189_p0 = scmp.lt.u32.totalorder %s185_s5, %s259_s3 }
  0xfd   :  { %p191_p1 = pnand %p189_p0, %p186_p13 }
  0xff   :  { %194 = shalt.err (!%p191_p1)
}
 0x100   :  { %116 = dma.vmem_to_hbm [thread:$0]  %s114_s30, 128, %s259_s3, [#allocation4]  }
 0x101   :  { %197 = dma.done.wait [#allocation4], 128  }
 0x102   :  { %198 = vsyncadd [#allocation4], 4294967168 }
 0x103   :  { %120 = vsyncpa [#allocation3], 1 }
 0x104   :  { %121 = vsyncpa [#allocation4], 1 }

</bundles_post_ra>
